<compile_context>
chip_gen: v7x
topology: tpu7x:2x2x1
jax: 0.10.0
libtpu: 0.0.40
codegen_flags: <defaults>
</compile_context>

<pallas_src>
import functools

import jax
import jax.numpy as jnp
from jax import lax
from jax.experimental import pallas as pl
from jax.experimental.pallas import tpu as pltpu


def _round_up(x, m):
    return (x + m - 1) // m * m


def _pow2_tile(n, target):
    """Power-of-two tile, >=128, <= max(target, 128), not far above n."""
    t = 128
    while t < target and t < n:
        t *= 2
    return t


def _default_exp_dtype():
    """bf16 exp on v6e / v7x (native bf16 EUP), f32 on v5e and older."""
    try:
        kind = jax.devices()[0].device_kind.lower()
    except Exception:
        return jnp.float32
    if ("v6" in kind) or ("v7" in kind) or ("tpu7" in kind):
        return jnp.bfloat16
    return jnp.float32


def _global_attn_kernel(x_q_ref, x_kv_ref, wq_ref, bq_ref, wkv_ref, bkv_ref,
                        o_ref, k_scr, v_scr, *, C, Dp, TKC, N, exp_dtype):
    qi = pl.program_id(1)
    Np = k_scr.shape[0]          # padded sequence length held in scratch
    TQ = x_q_ref.shape[0]
    Cp = v_scr.shape[1]

    # ---- Once per batch element (qi == 0): project K and V for the whole
    # image into VMEM scratch (fused single MXU matmul per chunk). This is the
    # hoisted projection: every later query tile reuses it for free.
    @pl.when(qi == 0)
    def _project_kv():
        def proj(c, carry):
            r = pl.multiple_of(c * TKC, TKC)
            xc = x_kv_ref[pl.ds(r, TKC), :].astype(jnp.bfloat16)       # (TKC, C)
            kv = jnp.dot(xc, wkv_ref[...],
                         preferred_element_type=jnp.float32) + bkv_ref[...]
            k_scr[pl.ds(r, TKC), :] = kv[:, :Dp].astype(jnp.bfloat16)
            v_scr[pl.ds(r, TKC), :] = kv[:, Dp:].astype(jnp.bfloat16)
            return carry
        lax.fori_loop(0, Np // TKC, proj, 0)

    # ---- Per query tile: project Q once (small matmul), keep f32 x for the
    # exact residual add in the epilogue.
    xq32 = x_q_ref[...]                                                # (TQ, C) f32
    q = (jnp.dot(xq32.astype(jnp.bfloat16), wq_ref[...],
                 preferred_element_type=jnp.float32) + bq_ref[...]
         ).astype(jnp.bfloat16)                                        # (TQ, Dp)

    def attend(start, valid, m, l, acc):
        k_c = k_scr[pl.ds(start, TKC), :]                              # (TKC, Dp)
        v_c = v_scr[pl.ds(start, TKC), :]                              # (TKC, Cp)
        # Q @ K^T : contract on the head dim, no explicit transpose.
        s = lax.dot_general(q, k_c, (((1,), (1,)), ((), ())),
                            preferred_element_type=jnp.float32)        # (TQ, TKC)
        if valid is not None:
            s = jnp.where(valid, s, -1e30)                             # mask padded keys
        m_new = jnp.maximum(m, jnp.max(s, axis=-1, keepdims=True))
        alpha = jnp.exp(m - m_new)
        # exp in bf16 on v6e/v7x (EUP bf16), f32 on v5e; running stats in f32.
        p = jnp.exp((s - m_new).astype(exp_dtype))
        l_new = alpha * l + jnp.sum(p.astype(jnp.float32), axis=-1, keepdims=True)
        acc_new = alpha * acc + jnp.dot(p.astype(jnp.bfloat16), v_c,
                                        preferred_element_type=jnp.float32)
        return m_new, l_new, acc_new

    m = jnp.full((TQ, 1), -jnp.inf, jnp.float32)
    l = jnp.zeros((TQ, 1), jnp.float32)
    acc = jnp.zeros((TQ, Cp), jnp.float32)

    n_full = N // TKC                         # static: chunks fully inside real data
    if n_full > 0:
        def body(c, carry):
            m_, l_, acc_ = carry
            start = pl.multiple_of(c * TKC, TKC)
            return attend(start, None, m_, l_, acc_)
        m, l, acc = lax.fori_loop(0, n_full, body, (m, l, acc))
    if N % TKC:                               # static: single masked tail chunk
        base = n_full * TKC
        valid = (lax.broadcasted_iota(jnp.int32, (1, TKC), 1) + base) < N
        m, l, acc = attend(base, valid, m, l, acc)

    out = acc * pl.reciprocal(l, approx=False)                          # (TQ, Cp)
    # Exact f32 residual from the original (unpadded) input; write real C only.
    o_ref[...] = out[:, :C] + xq32


def _prep_weights(params, C, Dp, Cp):
    """Conv2d 1x1 weights (Cout, Cin, 1, 1) -> (C, Cout_padded) bf16; f32 bias rows."""
    def w2(w, cout_pad):
        w2d = w.reshape(w.shape[0], w.shape[1]).T.astype(jnp.bfloat16)   # (C, Cout)
        return jnp.pad(w2d, ((0, 0), (0, cout_pad - w2d.shape[1])))

    def b2(b, cout_pad):
        return jnp.pad(b.astype(jnp.float32), (0, cout_pad - b.shape[0]))[None, :]

    wq = w2(params["wq"], Dp)
    bq = b2(params["bq"], Dp)
    wkv = jnp.concatenate([w2(params["wk"], Dp), w2(params["wv"], Cp)], axis=1)
    bkv = jnp.concatenate([b2(params["bk"], Dp), b2(params["bv"], Cp)], axis=1)
    return wq, bq, wkv, bkv


def global_attention_pallas(x_nchw, params, *, tq_target=512, tkc_target=512,
                            exp_dtype=None):
    """x_nchw: (B, C, H, W) float32.  Returns (B, C, H, W) float32."""
    B, C, H, W = x_nchw.shape
    N = H * W
    d_real = max(C // 8, 1)
    Dp = _round_up(d_real, 128)      # on-chip (VMEM-only) lane-dense head dim
    Cp = _round_up(C, 128)           # on-chip lane-dense value / accumulator dim

    TQ = _pow2_tile(N, tq_target)    # query tile (grid axis)
    TKC = _pow2_tile(N, tkc_target)  # key chunk (in-kernel loop)
    Np = _round_up(N, max(TQ, TKC))  # padded sequence length (pow2 tiles nest)

    if exp_dtype is None:
        exp_dtype = _default_exp_dtype()

    # NCHW -> (B, N, C) channels-last, f32, UNPADDED channels in HBM; only the
    # spatial axis is zero-padded (padded keys masked, padded queries sliced off).
    # TODO(synk): fuse this layout change into the producer/consumer in a model.
    x_nc = jnp.transpose(x_nchw.reshape(B, C, N), (0, 2, 1)).astype(jnp.float32)
    if Np > N:
        x_nc = jnp.pad(x_nc, ((0, 0), (0, Np - N), (0, 0)))

    wq, bq, wkv, bkv = _prep_weights(params, C, Dp, Cp)
    weight_spec = pl.BlockSpec(memory_space=pltpu.MemorySpace.VMEM)

    kernel = functools.partial(_global_attn_kernel, C=C, Dp=Dp, TKC=TKC, N=N,
                               exp_dtype=exp_dtype)

    # Advisory cost estimate so XLA schedules surrounding ops sensibly.
    flops = 2 * B * (Np * C * (2 * d_real + C) + Np * N * (d_real + C))
    cost = pl.CostEstimate(flops=int(flops),
                           transcendentals=int(B * Np * N),
                           bytes_accessed=int(4 * B * Np * C * 3))

    # VMEM budget (double-buffered blocks + scratch + in-flight intermediates),
    # capped so the request also fits v7x's 64 MiB per-core VMEM.
    est = (2 * Np * C * 4 + 4 * TQ * C * 4 + Np * (Dp + Cp) * 2
           + 8 * TQ * TKC * 4 + TQ * (Dp + Cp) * 4
           + C * (2 * Dp + Cp) * 2 + (2 << 20))
    vmem_limit = int(min(max(2 * est, 32 << 20), 56 << 20))

    out_pad = pl.pallas_call(
        kernel,
        out_shape=jax.ShapeDtypeStruct((B, Np, C), jnp.float32),
        grid_spec=pltpu.PrefetchScalarGridSpec(
            num_scalar_prefetch=0,
            grid=(B, Np // TQ),
            in_specs=[
                # query-row tile of x (f32, real C channels only)
                pl.BlockSpec((None, TQ, C), lambda b, qi: (b, qi, 0)),
                # whole-image slab of x for the once-per-batch K/V projection
                pl.BlockSpec((None, Np, C), lambda b, qi: (b, 0, 0)),
                weight_spec,   # wq   (C, Dp)       bf16
                weight_spec,   # bq   (1, Dp)       f32
                weight_spec,   # wkv  (C, Dp + Cp)  bf16
                weight_spec,   # bkv  (1, Dp + Cp)  f32
            ],
            out_specs=pl.BlockSpec((None, TQ, C), lambda b, qi: (b, qi, 0)),
            scratch_shapes=[
                pltpu.VMEM((Np, Dp), jnp.bfloat16),   # projected K (whole image)
                pltpu.VMEM((Np, Cp), jnp.bfloat16),   # projected V (whole image)
            ],
        ),
        compiler_params=pltpu.CompilerParams(
            # qi must run sequentially on one core (K/V scratch filled at qi==0);
            # batch is the parallel (megacore) axis.
            # TODO(synk): for B == 1 on v7x one TensorCore idles; shard queries
            # across cores with a per-core KV projection if that case matters.
            dimension_semantics=("parallel", "arbitrary"),
            vmem_limit_bytes=vmem_limit),
        cost_estimate=cost,
    )(x_nc, x_nc, wq, bq, wkv, bkv)

    out = out_pad[:, :N, :]
    return jnp.transpose(out, (0, 2, 1)).reshape(B, C, H, W)


def _reference(x_nchw, params):
    """Pure-JAX f32 reference mirroring the PyTorch forward exactly."""
    B, C, H, W = x_nchw.shape
    N = H * W
    d = params["wq"].shape[0]
    xf = x_nchw.reshape(B, C, N)
    wq = params["wq"].reshape(d, C)
    wk = params["wk"].reshape(d, C)
    wv = params["wv"].reshape(C, C)
    q = jnp.einsum("oc,bcn->bon", wq, xf) + params["bq"][None, :, None]
    k = jnp.einsum("oc,bcn->bon", wk, xf) + params["bk"][None, :, None]
    v = jnp.einsum("oc,bcn->bon", wv, xf) + params["bv"][None, :, None]
    attn = jax.nn.softmax(jnp.einsum("bcn,bcm->bnm", q, k), axis=-1)
    out = jnp.einsum("bcm,bnm->bcn", v, attn)
    return out.reshape(B, C, H, W) + x_nchw


if __name__ == "__main__":
    def make_params(key, C):
        d = max(C // 8, 1)
        k1, k2, k3, k4, k5, k6 = jax.random.split(key, 6)
        return {
            "wq": 0.1 * jax.random.normal(k1, (d, C, 1, 1), jnp.float32),
            "bq": 0.01 * jax.random.normal(k2, (d,), jnp.float32),
            "wk": 0.1 * jax.random.normal(k3, (d, C, 1, 1), jnp.float32),
            "bk": 0.01 * jax.random.normal(k4, (d,), jnp.float32),
            "wv": 0.1 * jax.random.normal(k5, (C, C, 1, 1), jnp.float32),
            "bv": 0.01 * jax.random.normal(k6, (C,), jnp.float32),
        }

    root = jax.random.PRNGKey(0)
    kx1, kp1, kx2, kp2 = jax.random.split(root, 4)

    # Test 1: tiny spatial extent -> single masked tail chunk + padded query rows.
    B1, C1, H1, W1 = 2, 32, 8, 8
    x1 = jax.random.normal(kx1, (B1, C1, H1, W1), jnp.float32)
    p1 = make_params(kp1, C1)
    out1 = jax.block_until_ready(global_attention_pallas(x1, p1))
    ref1 = _reference(x1, p1)
    assert out1.shape == (B1, C1, H1, W1)
    assert jnp.allclose(out1, ref1, atol=3e-2, rtol=3e-2), (
        f"test1 mismatch, max abs err {float(jnp.max(jnp.abs(out1 - ref1)))}")

    # Test 2: non-power-of-two N=676 -> full key chunks + masked tail + padded
    # query tile (exercises every masking/tiling path), B=1.
    B2, C2, H2, W2 = 1, 16, 26, 26
    x2 = jax.random.normal(kx2, (B2, C2, H2, W2), jnp.float32)
    p2 = make_params(kp2, C2)
    out2 = jax.block_until_ready(global_attention_pallas(x2, p2))
    ref2 = _reference(x2, p2)
    assert out2.shape == (B2, C2, H2, W2)
    assert jnp.allclose(out2, ref2, atol=3e-2, rtol=3e-2), (
        f"test2 mismatch, max abs err {float(jnp.max(jnp.abs(out2 - ref2)))}")

    print("KERNEL_OK")
</pallas_src>

<mosaic_0001>
module attributes {stable_mosaic.version = 11 : i64} {
  func.func @_global_attn_kernel(%arg0: i32, %arg1: i32, %arg2: memref<1x128x32xf32, #tpu.memory_space<vmem>>, %arg3: memref<1x128x32xf32, #tpu.memory_space<vmem>>, %arg4: memref<32x128xbf16, #tpu.memory_space<vmem>>, %arg5: memref<1x128xf32, #tpu.memory_space<vmem>>, %arg6: memref<32x256xbf16, #tpu.memory_space<vmem>>, %arg7: memref<1x256xf32, #tpu.memory_space<vmem>>, %arg8: memref<1x128x32xf32, #tpu.memory_space<vmem>>, %arg9: memref<128x128xbf16, #tpu.memory_space<vmem>>, %arg10: memref<128x128xbf16, #tpu.memory_space<vmem>>) attributes {dimension_semantics = [#tpu.dimension_semantics<parallel>, #tpu.dimension_semantics<arbitrary>], iteration_bounds = array<i64: 2, 1>, scalar_prefetch = 0 : i64, scratch_operands = 2 : i64, tpu.core_type = #tpu.core_type<tc>, window_params = [{transform_indices = @transform_0, window_bounds = array<i64: 1, 128, 32>}, {transform_indices = @transform_1, window_bounds = array<i64: 1, 128, 32>}, {pipeline_mode = #tpu.pipeline_mode<synchronous>, transform_indices = @transform_2, window_bounds = array<i64: 32, 128>}, {pipeline_mode = #tpu.pipeline_mode<synchronous>, transform_indices = @transform_3, window_bounds = array<i64: 1, 128>}, {pipeline_mode = #tpu.pipeline_mode<synchronous>, transform_indices = @transform_4, window_bounds = array<i64: 32, 256>}, {pipeline_mode = #tpu.pipeline_mode<synchronous>, transform_indices = @transform_5, window_bounds = array<i64: 1, 256>}, {transform_indices = @transform_6, window_bounds = array<i64: 1, 128, 32>}]} {
    %c0_i32 = arith.constant 0 : i32
    %0 = arith.cmpi eq, %arg1, %c0_i32 : i32
    %1 = arith.extui %0 : i1 to i32
    %c0_i32_0 = arith.constant 0 : i32
    %2 = arith.cmpi ne, %1, %c0_i32_0 : i32
    scf.if %2 {
      %c0_i32_23 = arith.constant 0 : i32
      %c128_i32 = arith.constant 128 : i32
      %52 = arith.muli %c0_i32_23, %c128_i32 : i32
      %53 = tpu.assume_multiple %52, 128 : i32
      %c0_24 = arith.constant 0 : index
      %54 = arith.index_cast %53 : i32 to index
      %c0_25 = arith.constant 0 : index
      %55 = vector.load %arg3[%c0_24, %54, %c0_25] : memref<1x128x32xf32, #tpu.memory_space<vmem>>, vector<1x128x32xf32>
      %56 = vector.shape_cast %55 : vector<1x128x32xf32> to vector<128x32xf32>
      %57 = arith.truncf %56 : vector<128x32xf32> to vector<128x32xbf16>
      %c0_26 = arith.constant 0 : index
      %c0_27 = arith.constant 0 : index
      %58 = vector.load %arg6[%c0_26, %c0_27] : memref<32x256xbf16, #tpu.memory_space<vmem>>, vector<32x256xbf16>
      %cst_28 = arith.constant dense<0.000000e+00> : vector<128x256xf32>
      %59 = tpu.matmul %57, %58, %cst_28 {dimension_numbers = #tpu.dot_dimension_numbers<[1], [0], [0], [1], [0, 0, 1, 1], [], []>} : vector<128x32xbf16>, vector<32x256xbf16>, vector<128x256xf32> -> vector<128x256xf32>
      %c0_29 = arith.constant 0 : index
      %c0_30 = arith.constant 0 : index
      %60 = vector.load %arg7[%c0_29, %c0_30] : memref<1x256xf32, #tpu.memory_space<vmem>>, vector<1x256xf32>
      %61 = vector.broadcast %60 : vector<1x256xf32> to vector<128x256xf32>
      %62 = arith.addf %59, %61 : vector<128x256xf32>
      %63 = vector.extract_strided_slice %62 {offsets = [0, 0], sizes = [128, 128], strides = [1, 1]} : vector<128x256xf32> to vector<128x128xf32>
      %64 = arith.truncf %63 : vector<128x128xf32> to vector<128x128xbf16>
      %65 = arith.index_cast %53 : i32 to index
      %c0_31 = arith.constant 0 : index
      %66 = vector.load %arg9[%65, %c0_31] : memref<128x128xbf16, #tpu.memory_space<vmem>>, vector<128x128xbf16>
      tpu.vector_store %arg9[%65, %c0_31], %64 {strides = array<i32>} : memref<128x128xbf16, #tpu.memory_space<vmem>>, vector<128x128xbf16>,
      %67 = vector.extract_strided_slice %62 {offsets = [0, 128], sizes = [128, 128], strides = [1, 1]} : vector<128x256xf32> to vector<128x128xf32>
      %68 = arith.truncf %67 : vector<128x128xf32> to vector<128x128xbf16>
      %69 = arith.index_cast %53 : i32 to index
      %c0_32 = arith.constant 0 : index
      %70 = vector.load %arg10[%69, %c0_32] : memref<128x128xbf16, #tpu.memory_space<vmem>>, vector<128x128xbf16>
      tpu.vector_store %arg10[%69, %c0_32], %68 {strides = array<i32>} : memref<128x128xbf16, #tpu.memory_space<vmem>>, vector<128x128xbf16>,
      %c1_i32 = arith.constant 1 : i32
    } else {
    }
    %c0 = arith.constant 0 : index
    %c0_1 = arith.constant 0 : index
    %c0_2 = arith.constant 0 : index
    %3 = vector.load %arg2[%c0, %c0_1, %c0_2] : memref<1x128x32xf32, #tpu.memory_space<vmem>>, vector<1x128x32xf32>
    %4 = vector.shape_cast %3 : vector<1x128x32xf32> to vector<128x32xf32>
    %5 = arith.truncf %4 : vector<128x32xf32> to vector<128x32xbf16>
    %c0_3 = arith.constant 0 : index
    %c0_4 = arith.constant 0 : index
    %6 = vector.load %arg4[%c0_3, %c0_4] : memref<32x128xbf16, #tpu.memory_space<vmem>>, vector<32x128xbf16>
    %cst = arith.constant dense<0.000000e+00> : vector<128x128xf32>
    %7 = tpu.matmul %5, %6, %cst {dimension_numbers = #tpu.dot_dimension_numbers<[1], [0], [0], [1], [0, 0, 1, 1], [], []>} : vector<128x32xbf16>, vector<32x128xbf16>, vector<128x128xf32> -> vector<128x128xf32>
    %c0_5 = arith.constant 0 : index
    %c0_6 = arith.constant 0 : index
    %8 = vector.load %arg5[%c0_5, %c0_6] : memref<1x128xf32, #tpu.memory_space<vmem>>, vector<1x128xf32>
    %9 = vector.broadcast %8 : vector<1x128xf32> to vector<128x128xf32>
    %10 = arith.addf %7, %9 : vector<128x128xf32>
    %11 = arith.truncf %10 : vector<128x128xf32> to vector<128x128xbf16>
    %cst_7 = arith.constant 0xFF800000 : f32
    %12 = vector.broadcast %cst_7 : f32 to vector<128x1xf32>
    %cst_8 = arith.constant 0.000000e+00 : f32
    %13 = vector.broadcast %cst_8 : f32 to vector<128x1xf32>
    %cst_9 = arith.constant 0.000000e+00 : f32
    %14 = vector.broadcast %cst_9 : f32 to vector<128x128xf32>
    %15 = tpu.iota {dimensions = array<i32: 1>} : vector<1x128xi32>
    %c0_i32_10 = arith.constant 0 : i32
    %16 = vector.broadcast %c0_i32_10 : i32 to vector<1x128xi32>
    %17 = arith.addi %15, %16 : vector<1x128xi32>
    %c64_i32 = arith.constant 64 : i32
    %18 = vector.broadcast %c64_i32 : i32 to vector<1x128xi32>
    %19 = arith.cmpi slt, %17, %18 : vector<1x128xi32>
    %c0_11 = arith.constant 0 : index
    %c0_12 = arith.constant 0 : index
    %20 = vector.load %arg9[%c0_11, %c0_12] : memref<128x128xbf16, #tpu.memory_space<vmem>>, vector<128x128xbf16>
    %c0_13 = arith.constant 0 : index
    %c0_14 = arith.constant 0 : index
    %21 = vector.load %arg10[%c0_13, %c0_14] : memref<128x128xbf16, #tpu.memory_space<vmem>>, vector<128x128xbf16>
    %cst_15 = arith.constant dense<0.000000e+00> : vector<128x128xf32>
    %22 = tpu.matmul %11, %20, %cst_15 {dimension_numbers = #tpu.dot_dimension_numbers<[1], [1], [0], [0], [0, 0, 1, 0], [], []>} : vector<128x128xbf16>, vector<128x128xbf16>, vector<128x128xf32> -> vector<128x128xf32>
    %cst_16 = arith.constant -1.000000e+30 : f32
    %23 = vector.shape_cast %19 : vector<1x128xi1> to vector<1x128xi1>
    %24 = vector.broadcast %23 : vector<1x128xi1> to vector<128x128xi1>
    %25 = vector.broadcast %cst_16 : f32 to vector<128x128xf32>
    %26 = arith.select %24, %22, %25 : vector<128x128xi1>, vector<128x128xf32>
    %cst_17 = arith.constant dense<0xFF800000> : vector<128xf32>
    %27 = vector.multi_reduction <maximumf>, %26, %cst_17 [1] : vector<128x128xf32> to vector<128xf32>
    %28 = vector.shape_cast %27 : vector<128xf32> to vector<128x1xf32>
    %29 = arith.maximumf %12, %28 : vector<128x1xf32>
    %30 = arith.subf %12, %29 : vector<128x1xf32>
    %31 = math.exp %30 : vector<128x1xf32>
    %32 = vector.broadcast %29 : vector<128x1xf32> to vector<128x128xf32>
    %33 = arith.subf %26, %32 : vector<128x128xf32>
    %34 = math.exp %33 : vector<128x128xf32>
    %35 = arith.mulf %31, %13 : vector<128x1xf32>
    %cst_18 = arith.constant dense<0.000000e+00> : vector<128xf32>
    %36 = vector.multi_reduction <add>, %34, %cst_18 [1] : vector<128x128xf32> to vector<128xf32>
    %37 = vector.shape_cast %36 : vector<128xf32> to vector<128x1xf32>
    %38 = arith.addf %35, %37 : vector<128x1xf32>
    %39 = vector.broadcast %31 : vector<128x1xf32> to vector<128x128xf32>
    %40 = arith.mulf %39, %14 : vector<128x128xf32>
    %41 = arith.truncf %34 : vector<128x128xf32> to vector<128x128xbf16>
    %cst_19 = arith.constant dense<0.000000e+00> : vector<128x128xf32>
    %42 = tpu.matmul %41, %21, %cst_19 {dimension_numbers = #tpu.dot_dimension_numbers<[1], [0], [0], [1], [0, 0, 1, 1], [], []>} : vector<128x128xbf16>, vector<128x128xbf16>, vector<128x128xf32> -> vector<128x128xf32>
    %43 = arith.addf %40, %42 : vector<128x128xf32>
    %44 = tpu.reciprocal %38 : vector<128x1xf32> -> vector<128x1xf32>
    %45 = vector.broadcast %44 : vector<128x1xf32> to vector<128x128xf32>
    %46 = arith.mulf %43, %45 : vector<128x128xf32>
    %47 = vector.extract_strided_slice %46 {offsets = [0, 0], sizes = [128, 32], strides = [1, 1]} : vector<128x128xf32> to vector<128x32xf32>
    %48 = arith.addf %47, %4 : vector<128x32xf32>
    %c0_20 = arith.constant 0 : index
    %c0_21 = arith.constant 0 : index
    %c0_22 = arith.constant 0 : index
    %49 = vector.load %arg8[%c0_20, %c0_21, %c0_22] : memref<1x128x32xf32, #tpu.memory_space<vmem>>, vector<1x128x32xf32>
    %50 = vector.shape_cast %49 : vector<1x128x32xf32> to vector<128x32xf32>
    %51 = vector.shape_cast %48 : vector<128x32xf32> to vector<1x128x32xf32>
    tpu.vector_store %arg8[%c0_20, %c0_21, %c0_22], %51 {strides = array<i32>} : memref<1x128x32xf32, #tpu.memory_space<vmem>>, vector<1x128x32xf32>,
    return
  }
  func.func @transform_0(%arg0: i32, %arg1: i32) -> (i32, i32, i32) {
    %c0_i32 = arith.constant 0 : i32
    %c0_i32_0 = arith.constant 0 : i32
    return %arg0, %arg1, %c0_i32 : i32, i32, i32
  }
  func.func @transform_1(%arg0: i32, %arg1: i32) -> (i32, i32, i32) {
    %c0_i32 = arith.constant 0 : i32
    %c0_i32_0 = arith.constant 0 : i32
    %c0_i32_1 = arith.constant 0 : i32
    return %arg0, %c0_i32, %c0_i32_0 : i32, i32, i32
  }
  func.func @transform_2(%arg0: i32, %arg1: i32) -> (i32, i32) {
    %c0_i32 = arith.constant 0 : i32
    %c0_i32_0 = arith.constant 0 : i32
    %c0_i32_1 = arith.constant 0 : i32
    return %c0_i32, %c0_i32_0 : i32, i32
  }
  func.func @transform_3(%arg0: i32, %arg1: i32) -> (i32, i32) {
    %c0_i32 = arith.constant 0 : i32
    %c0_i32_0 = arith.constant 0 : i32
    %c0_i32_1 = arith.constant 0 : i32
    return %c0_i32, %c0_i32_0 : i32, i32
  }
  func.func @transform_4(%arg0: i32, %arg1: i32) -> (i32, i32) {
    %c0_i32 = arith.constant 0 : i32
    %c0_i32_0 = arith.constant 0 : i32
    %c0_i32_1 = arith.constant 0 : i32
    return %c0_i32, %c0_i32_0 : i32, i32
  }
  func.func @transform_5(%arg0: i32, %arg1: i32) -> (i32, i32) {
    %c0_i32 = arith.constant 0 : i32
    %c0_i32_0 = arith.constant 0 : i32
    %c0_i32_1 = arith.constant 0 : i32
    return %c0_i32, %c0_i32_0 : i32, i32
  }
  func.func @transform_6(%arg0: i32, %arg1: i32) -> (i32, i32, i32) {
    %c0_i32 = arith.constant 0 : i32
    %c0_i32_0 = arith.constant 0 : i32
    return %arg0, %arg1, %c0_i32 : i32, i32, i32
  }
}

</mosaic_0001>

<bundles_post_ra>
// kernel: tpu_custom_call.1
= control target key start
LH: loop header
LB: loop body
LE: loop exit
PB: predicated region body
PF: predicated region fallthrough
CT: control target
= control target key end

     0   :  { %s1702_s21 = smov 0   ;;  %s1704_s22 = smov 0   ;;  %s2138_s0 = inlined_call_operand.vmem [shape: f32[2,128,32], index: 0, kind: input, shape index: {}]   ;;  %s2139_s1 = inlined_call_operand.vmem [shape: f32[2,128,32], index: 1, kind: input, shape index: {}]   ;;  %s2140_s2 = inlined_call_operand.vmem [shape: bf16[32,128], index: 2, kind: input, shape index: {}]   ;;  %s2141_s3 = inlined_call_operand.vmem [shape: f32[1,128], index: 3, kind: input, shape index: {}]   ;;  %s2142_s4 = inlined_call_operand.vmem [shape: bf16[32,256], index: 4, kind: input, shape index: {}]   ;;  %s2143_s5 = inlined_call_operand.vmem [shape: f32[1,256], index: 5, kind: input, shape index: {}]   ;;  %s2144_s6 = inlined_call_operand.vmem [shape: f32[2,128,32], index: 6, kind: output, shape index: {}]  }
   0x1   :  { %s1706_s23 = smov 0  }
   0x2 LB: > { %s28_s24 = sadd.s32 1, %s1660_s22  ;;  %p1337_p0 = scmp.ge.s32.totalorder %s1664_s23, 1  ;;  %s1664_s23 = sphi %s1706_s23, %s16_s23   ;;  %s1660_s22 = sphi %s1704_s22, %s2146_s22   ;;  %s1656_s21 = sphi %s1702_s21, %s2145_s21  }
   0x3   : > { %p30_p1 = scmp.ge.s32.totalorder %s28_s24, 2  ;;  %p243_p2 = scmp.lt.s32.totalorder %s1664_s23, 3 }
   0x5   : > { %s2148_s24 = smov (%p30_p1, %s28_s24), 0  ;;  %p244_p3 = pnand %p1337_p0, %p243_p2 }
   0x6   : > { %v1523_v0 = vld [vmem:[%s2142_s4 + $0x4] ss:$8 sps:$4 sm:$0xff] (!%p244_p3)   ;;  %p287_p4 = scmp.lt.s32.totalorder (!%p244_p3), %s1656_s21, 1  ;;  %v1525_v1 = vld [vmem:[%s2142_s4] ss:$8 sps:$4 sm:$0xff] (!%p244_p3)   ;;  %v1666_v2 = vmov (!%p244_p3), 0   ;;  %v346_v55 = vlaneseq (!%p244_p3) }
   0x7   : > { %247 = sbr.rel (%p244_p3) target bundleno = 927 (0x39f), region = 44  ;;  %433 = vmatprep.mubr.bf16.mxu0 (!%p244_p3), %v1666_v2  ;;  %401 = vmatprep.subr.bf16.mxu0 (!%p244_p3), %v1523_v0  ;;  %v1526_v3 = vld [vmem:[%s2142_s4 + $0x14] ss:$8 sps:$4 sm:$0xff] (!%p244_p3)   ;;  %v1528_v4 = vld [vmem:[%s2142_s4 + $0x10] ss:$8 sps:$4 sm:$0xff] (!%p244_p3)   ;;  %v1529_v5 = vld [vmem:[%s2140_s2] sm:$0xff] (!%p244_p3)  }
   0x8   : > { %402 = vmatpush1.bf16.msra.mxu0 (!%p244_p3), %v1525_v1  ;;  %1414 = vmatprep.subr.bf16.mxu1 (!%p244_p3), %v1529_v5  ;;  %v1530_v6 = vld [vmem:[%s2140_s2 + $0x8] sm:$0xff] (!%p244_p3)   ;;  %vm376_vm0 = vcmask (!%p244_p3), 261120   ;;  %v347_v56 = vshrl.u32 (!%p244_p3), %v346_v55, 7  ;;  %v344_v58 = vld [vmem:[%s2143_s5] sm:$0x3] (!%p244_p3) }
   0x9   : > { %403 = vmatprep.subr.bf16.mxu0 (!%p244_p3), %v1526_v3  ;;  %1415 = vmatpush3.bf16.msra.mxu1 (!%p244_p3), %v1529_v5 }
   0xa   : > { %1416 = vmatprep.subr.bf16.mxu1 (!%p244_p3), %v1530_v6  ;;  %v348_v57 = vsub.s32 (!%p244_p3), 0, %v347_v56  ;;  %v352_v59 = vsub.s32 (!%p244_p3), 1, %v347_v56 }
   0xc   : > { %404 = vmatpush1.bf16.msra.mxu0 (!%p244_p3), %v1528_v4  ;;  %v1815_v60 = vrot.slane (!%p244_p3), %v344_v58, %v348_v57  ;;  %v1817_v62 = vrot.slane (!%p244_p3), %v344_v58, %v352_v59  ;;  %v1824_v4 = vld [vmem:[%s2141_s3] ss:$0 sm:$0xff] (!%p244_p3) }
   0xd   : > { %1417 = vmatpush3.bf16.msra.mxu1 (!%p244_p3), %v1530_v6 }
   0xe   : > { %s2150_s21 = smov (!%p287_p4, %s1656_s21), 1 }
   0xf   : > { %s1736_s11 = sshll.u32 %s2150_s21, 7 }
  0x10   : > { %s1745_s16 = scalar_lea.vmem %s2139_s1, %s1736_s11  ;;  %s1753_s19 = scalar_lea.vmem %s2138_s0, %s1736_s11 }
  0x11   : > { %v316_v7 = vld [vmem:[%s1745_s16] sm:$0xff]  ;;  %v317_v8 = vld [vmem:[%s1745_s16 + $0x8] sm:$0xff]  ;;  %v318_v10 = vld [vmem:[%s1745_s16 + $0x10] sm:$0xff]  ;;  %s2055_s29 = scalar_lea.vmem %s2144_s6, %s1736_s11 }
  0x12   : > { %v332_v9 = vpack.c.bf16 %v317_v8, %v316_v7  ;;  %v319_v11 = vld [vmem:[%s1745_s16 + $0x18] sm:$0xff]  ;;  %v546_v12 = vld [vmem:[%s1753_s19] sm:$0xff]  ;;  %v547_v13 = vld [vmem:[%s1753_s19 + $0x8] sm:$0xff] }
  0x13   : > { %v562_v14 = vpack.c.bf16 %v547_v13, %v546_v12  ;;  %v1762_v15 = vld [vmem:[%s1753_s19 + $0x10] sm:$0xff]  ;;  %v549_v16 = vld [vmem:[%s1753_s19 + $0x18] sm:$0xff]  ;;  %v550_v17 = vld [vmem:[%s1753_s19 + $0x20] sm:$0xff]  ;;  %v333_v20 = vpack.c.bf16 %v319_v11, %v318_v10 }
  0x14   : > { %1348 = vmatmul.mubr.msk.bf16.vlgmr.msra.gmra.mrb[0].mxu0 %vm376_vm0, %v332_v9  ;;  %v563_v18 = vpack.c.bf16 %v549_v16, %v1762_v15  ;;  %v551_v19 = vld [vmem:[%s1753_s19 + $0x28] sm:$0xff]  ;;  %v552_v22 = vld [vmem:[%s1753_s19 + $0x30] sm:$0xff]  ;;  %v553_v23 = vld [vmem:[%s1753_s19 + $0x38] sm:$0xff] }
  0x15   : > { %443 = vmatprep.mubr.bf16.mxu0 %v1666_v2  ;;  %1418 = vmatprep.mubr.msk.bf16.mxu1 %vm376_vm0, %v562_v14  ;;  %v564_v21 = vpack.c.bf16 %v551_v19, %v550_v17  ;;  %v554_v24 = vld [vmem:[%s1753_s19 + $0x40] sm:$0xff]  ;;  %v555_v25 = vld [vmem:[%s1753_s19 + $0x48] sm:$0xff]  ;;  %v565_v28 = vpack.c.bf16 %v553_v23, %v552_v22  ;;  %v556_v31 = vld [vmem:[%s1753_s19 + $0x50] sm:$0xff] }
  0x16   : > { %1419 = vmatmul.mubr.msk.bf16.vlgmr.msra.gmra.mrb[0].mxu1 %vm376_vm0, %v563_v18  ;;  %v320_v26 = vld [vmem:[%s1745_s16 + $0x20] sm:$0xff]  ;;  %v321_v27 = vld [vmem:[%s1745_s16 + $0x28] sm:$0xff]  ;;  %v566_v29 = vpack.c.bf16 %v555_v25, %v554_v24  ;;  %v557_v32 = vld [vmem:[%s1753_s19 + $0x58] sm:$0xff] }
  0x17   : > { %1422 = vmatprep.mubr.msk.bf16.mxu1 %vm376_vm0, %v564_v21  ;;  %v334_v30 = vpack.c.bf16 %v321_v27, %v320_v26  ;;  %v558_v33 = vld [vmem:[%s1753_s19 + $0x60] sm:$0xff]  ;;  %v559_v34 = vld [vmem:[%s1753_s19 + $0x68] sm:$0xff]  ;;  %v322_v35 = vld [vmem:[%s1745_s16 + $0x30] sm:$0xff]  ;;  %v567_v37 = vpack.c.bf16 %v557_v32, %v556_v31 }
  0x18   : > { %v323_v36 = vld [vmem:[%s1745_s16 + $0x38] sm:$0xff]  ;;  %v568_v38 = vpack.c.bf16 %v559_v34, %v558_v33  ;;  %v560_v40 = vld [vmem:[%s1753_s19 + $0x70] sm:$0xff]  ;;  %v324_v42 = vld [vmem:[%s1745_s16 + $0x40] sm:$0xff] }
  0x19   : > { %v335_v39 = vpack.c.bf16 %v323_v36, %v322_v35  ;;  %v561_v41 = vld [vmem:[%s1753_s19 + $0x78] sm:$0xff]  ;;  %v325_v43 = vld [vmem:[%s1745_s16 + $0x48] sm:$0xff]  ;;  %v326_v46 = vld [vmem:[%s1745_s16 + $0x50] sm:$0xff] }
  0x1a   : > { %v569_v44 = vpack.c.bf16 %v561_v41, %v560_v40  ;;  %v336_v45 = vpack.c.bf16 %v325_v43, %v324_v42  ;;  %v327_v47 = vld [vmem:[%s1745_s16 + $0x58] sm:$0xff]  ;;  %v328_v49 = vld [vmem:[%s1745_s16 + $0x60] sm:$0xff]  ;;  %v329_v50 = vld [vmem:[%s1745_s16 + $0x68] sm:$0xff] }
  0x1b   : > { %v337_v48 = vpack.c.bf16 %v327_v47, %v326_v46  ;;  %v338_v51 = vpack.c.bf16 %v329_v50, %v328_v49  ;;  %v330_v52 = vld [vmem:[%s1745_s16 + $0x70] sm:$0xff]  ;;  %v331_v53 = vld [vmem:[%s1745_s16 + $0x78] sm:$0xff] }
  0x1c   : > { %1349 = vmatmul.mubr.msk.bf16.gmra.mrb[4].mxu0 %vm376_vm0, %v333_v20  ;;  %v339_v54 = vpack.c.bf16 %v331_v53, %v330_v52 }
  0x1d   : > { %453 = vmatprep.mubr.bf16.mxu0 %v1666_v2 }
  0x1e   : > { %1423 = vmatmul.mubr.msk.bf16.gmra.mrb[4].mxu1 %vm376_vm0, %v565_v28 }
  0x1f   : > { %1426 = vmatprep.mubr.msk.bf16.mxu1 %vm376_vm0, %v566_v29 }
  0x24   : > { %1350 = vmatmul.mubr.msk.bf16.gmra.mrb[8].mxu0 %vm376_vm0, %v334_v30 }
  0x25   : > { %463 = vmatprep.mubr.bf16.mxu0 %v1666_v2 }
  0x26   : > { %1427 = vmatmul.mubr.msk.bf16.gmra.mrb[8].mxu1 %vm376_vm0, %v567_v37 }
  0x27   : > { %1430 = vmatprep.mubr.msk.bf16.mxu1 %vm376_vm0, %v568_v38 }
  0x2c   : > { %1351 = vmatmul.mubr.msk.bf16.gmra.mrb[12].mxu0 %vm376_vm0, %v335_v39 }
  0x2d   : > { %473 = vmatprep.mubr.bf16.mxu0 %v1666_v2 }
  0x2e   : > { %1431 = vmatmul.mubr.msk.bf16.gmra.mrb[12].mxu1 %vm376_vm0, %v569_v44 }
  0x34   : > { %1352 = vmatmul.mubr.msk.bf16.gmra.mrb[16].mxu0 %vm376_vm0, %v336_v45 }
  0x35   : > { %483 = vmatprep.mubr.bf16.mxu0 %v1666_v2 }
  0x3c   : > { %1353 = vmatmul.mubr.msk.bf16.gmra.mrb[20].mxu0 %vm376_vm0, %v337_v48 }
  0x3d   : > { %493 = vmatprep.mubr.bf16.mxu0 %v1666_v2 }
  0x44   : > { %1354 = vmatmul.mubr.msk.bf16.gmra.mrb[24].mxu0 %vm376_vm0, %v338_v51 }
  0x45   : > { %503 = vmatprep.mubr.bf16.mxu0 %v1666_v2 }
  0x4c   : > { %1355 = vmatmul.mubr.msk.bf16.gmra.mrb[28].mxu0 %vm376_vm0, %v339_v54 }
  0xe7   : > { %v435_v61 = vpop.f32.mrb[0].mxu0 }
  0xe8   : > { %v437_v63 = vpop.f32.mrb[1].mxu0  ;;  %v436_v1 = vadd.f32 %v435_v61, %v1815_v60 }
  0xe9   : > { %v439_v0 = vpop.f32.mrb[2].mxu0  ;;  %v438_v5 = vadd.f32 %v437_v63, %v1817_v62  ;;  %v1420_v8 = vpop.f32.mrb[0].mxu1 }
  0xea   : > { %v440_v2 = vadd.f32 %v439_v0, %v1815_v60  ;;  %v441_v3 = vpop.f32.mrb[3].mxu0  ;;  %v1829_v10 = vadd.f32 %v1420_v8, %v1824_v4  ;;  %v652_v11 = vpop.f32.mrb[1].mxu1 }
  0xeb   : > { %v442_v6 = vadd.f32 %v441_v3, %v1817_v62  ;;  %v653_v12 = vadd.f32 %v1824_v4, %v652_v11  ;;  %v1421_v13 = vpop.f32.mrb[2].mxu1 }
  0xec   : > { %v514_v7 = vpack.c.bf16 %v440_v2, %v436_v1  ;;  %v1833_v16 = vadd.f32 %v1421_v13, %v1824_v4  ;;  %v655_v17 = vpop.f32.mrb[3].mxu1 }
  0xed   : > { %v530_v9 = vpack.c.bf16 %v442_v6, %v438_v5  ;;  %v656_v19 = vadd.f32 %v1824_v4, %v655_v17 }
  0xee   : > { %1434 = vmatprep.subr.bf16.mxu0 %v514_v7  ;;  %v716_v21 = vpack.c.bf16 %v1833_v16, %v1829_v10 }
  0xef   : > { %v445_v14 = vpop.f32.mrb[4].mxu0  ;;  %1435 = vmatpush3.bf16.xpose.msra.mxu0 %v514_v7  ;;  %1466 = vmatprep.subr.bf16.mxu1 %v530_v9  ;;  %v715_v25 = vpack.c.bf16 %v656_v19, %v653_v12 }
  0xf0   : > { %v447_v18 = vpop.f32.mrb[5].mxu0  ;;  %1467 = vmatpush3.bf16.msra.mxu1 %v530_v9  ;;  %v446_v22 = vadd.f32 %v445_v14, %v1815_v60 }
  0xf1   : > { %v449_v20 = vpop.f32.mrb[6].mxu0  ;;  %v448_v26 = vadd.f32 %v447_v18, %v1817_v62  ;;  %v1424_v29 = vpop.f32.mrb[4].mxu1  ;;  %1450 = vmatprep.mubr.bf16.mxu0 %v715_v25 }
  0xf2   : > { %v450_v23 = vadd.f32 %v449_v20, %v1815_v60  ;;  %v451_v24 = vpop.f32.mrb[7].mxu0  ;;  %v1843_v31 = vadd.f32 %v1424_v29, %v1824_v4  ;;  %v668_v32 = vpop.f32.mrb[5].mxu1 }
  0xf3   : > { %v452_v27 = vadd.f32 %v451_v24, %v1817_v62  ;;  %v1846_v33 = vadd.f32 %v1824_v4, %v668_v32  ;;  %v1425_v34 = vpop.f32.mrb[6].mxu1 }
  0xf4   : > { %v515_v28 = vpack.c.bf16 %v450_v23, %v446_v22  ;;  %v1849_v36 = vadd.f32 %v1425_v34, %v1824_v4  ;;  %v671_v37 = vpop.f32.mrb[7].mxu1 }
  0xf5   : > { %v531_v30 = vpack.c.bf16 %v452_v27, %v448_v26  ;;  %v1852_v39 = vadd.f32 %v1824_v4, %v671_v37 }
  0xf6   : > { %1436 = vmatprep.subr.bf16.mxu0 %v515_v28  ;;  %v718_v41 = vpack.c.bf16 %v1849_v36, %v1843_v31 }
  0xf7   : > { %v455_v35 = vpop.f32.mrb[8].mxu0  ;;  %1437 = vmatpush3.bf16.xpose.msra.mxu0 %v515_v28  ;;  %1468 = vmatprep.subr.bf16.mxu1 %v531_v30  ;;  %v717_v45 = vpack.c.bf16 %v1852_v39, %v1846_v33 }
  0xf8   : > { %v457_v38 = vpop.f32.mrb[9].mxu0  ;;  %1469 = vmatpush3.bf16.msra.mxu1 %v531_v30  ;;  %v456_v42 = vadd.f32 %v455_v35, %v1815_v60 }
  0xf9   : > { %v459_v40 = vpop.f32.mrb[10].mxu0  ;;  %v458_v46 = vadd.f32 %v457_v38, %v1817_v62  ;;  %v1428_v49 = vpop.f32.mrb[8].mxu1 }
  0xfa   : > { %v460_v43 = vadd.f32 %v459_v40, %v1815_v60  ;;  %v461_v44 = vpop.f32.mrb[11].mxu0  ;;  %v1863_v51 = vadd.f32 %v1428_v49, %v1824_v4  ;;  %v684_v52 = vpop.f32.mrb[9].mxu1 }
  0xfb   : > { %v462_v47 = vadd.f32 %v461_v44, %v1817_v62  ;;  %v1866_v53 = vadd.f32 %v1824_v4, %v684_v52  ;;  %v1429_v54 = vpop.f32.mrb[10].mxu1 }
  0xfc   : > { %v516_v48 = vpack.c.bf16 %v460_v43, %v456_v42  ;;  %v1869_v57 = vadd.f32 %v1429_v54, %v1824_v4  ;;  %v687_v58 = vpop.f32.mrb[11].mxu1 }
  0xfd   : > { %v532_v50 = vpack.c.bf16 %v462_v47, %v458_v46  ;;  %v1872_v61 = vadd.f32 %v1824_v4, %v687_v58 }
  0xfe   : > { %1438 = vmatprep.subr.bf16.mxu0 %v516_v48  ;;  %v720_v0 = vpack.c.bf16 %v1869_v57, %v1863_v51 }
  0xff   : > { %v465_v56 = vpop.f32.mrb[12].mxu0  ;;  %1439 = vmatpush3.bf16.xpose.msra.mxu0 %v516_v48  ;;  %1470 = vmatprep.subr.bf16.mxu1 %v532_v50  ;;  %v719_v5 = vpack.c.bf16 %v1872_v61, %v1866_v53 }
 0x100   : > { %v467_v59 = vpop.f32.mrb[13].mxu0  ;;  %1471 = vmatpush3.bf16.msra.mxu1 %v532_v50  ;;  %v466_v1 = vadd.f32 %v465_v56, %v1815_v60 }
 0x101   : > { %v469_v63 = vpop.f32.mrb[14].mxu0  ;;  %v468_v6 = vadd.f32 %v467_v59, %v1817_v62  ;;  %v1432_v9 = vpop.f32.mrb[12].mxu1 }
 0x102   : > { %v470_v2 = vadd.f32 %v469_v63, %v1815_v60  ;;  %v471_v3 = vpop.f32.mrb[15].mxu0  ;;  %v1883_v12 = vadd.f32 %v1432_v9, %v1824_v4  ;;  %v700_v13 = vpop.f32.mrb[13].mxu1 }
 0x103   : > { %v472_v7 = vadd.f32 %v471_v3, %v1817_v62  ;;  %v1886_v14 = vadd.f32 %v1824_v4, %v700_v13  ;;  %v1433_v17 = vpop.f32.mrb[14].mxu1 }
 0x104   : > { %v517_v8 = vpack.c.bf16 %v470_v2, %v466_v1  ;;  %v1889_v19 = vadd.f32 %v1433_v17, %v1824_v4  ;;  %v703_v20 = vpop.f32.mrb[15].mxu1 }
 0x105   : > { %v533_v11 = vpack.c.bf16 %v472_v7, %v468_v6  ;;  %v704_v23 = vadd.f32 %v1824_v4, %v703_v20 }
 0x106   : > { %1440 = vmatprep.subr.bf16.mxu0 %v517_v8  ;;  %v722_v25 = vpack.c.bf16 %v1889_v19, %v1883_v12 }
 0x107   : > { %v475_v18 = vpop.f32.mrb[16].mxu0  ;;  %1441 = vmatpush3.bf16.xpose.msra.mxu0 %v517_v8  ;;  %1472 = vmatprep.subr.bf16.mxu1 %v533_v11  ;;  %v721_v29 = vpack.c.bf16 %v704_v23, %v1886_v14 }
 0x108   : > { %v477_v22 = vpop.f32.mrb[17].mxu0  ;;  %1473 = vmatpush3.bf16.msra.mxu1 %v533_v11  ;;  %v476_v26 = vadd.f32 %v475_v18, %v1815_v60 }
 0x109   : > { %v479_v24 = vpop.f32.mrb[18].mxu0  ;;  %v478_v30 = vadd.f32 %v477_v22, %v1817_v62 }
 0x10a   : > { %v480_v27 = vadd.f32 %v479_v24, %v1815_v60  ;;  %v481_v28 = vpop.f32.mrb[19].mxu0 }
 0x10b   : > { %v482_v32 = vadd.f32 %v481_v28, %v1817_v62 }
 0x10c   : > { %v518_v34 = vpack.c.bf16 %v480_v27, %v476_v26 }
 0x10d   : > { %v534_v35 = vpack.c.bf16 %v482_v32, %v478_v30 }
 0x10e   : > { %1442 = vmatprep.subr.bf16.mxu0 %v518_v34 }
 0x10f   : > { %v485_v37 = vpop.f32.mrb[20].mxu0  ;;  %1443 = vmatpush3.bf16.xpose.msra.mxu0 %v518_v34  ;;  %1474 = vmatprep.subr.bf16.mxu1 %v534_v35 }
 0x110   : > { %v487_v4 = vpop.f32.mrb[21].mxu0  ;;  %1475 = vmatpush3.bf16.msra.mxu1 %v534_v35  ;;  %v486_v40 = vadd.f32 %v485_v37, %v1815_v60 }
 0x111   : > { %v489_v38 = vpop.f32.mrb[22].mxu0  ;;  %v488_v44 = vadd.f32 %v487_v4, %v1817_v62 }
 0x112   : > { %v490_v42 = vadd.f32 %v489_v38, %v1815_v60  ;;  %v491_v43 = vpop.f32.mrb[23].mxu0 }
 0x113   : > { %v492_v46 = vadd.f32 %v491_v43, %v1817_v62 }
 0x114   : > { %v519_v47 = vpack.c.bf16 %v490_v42, %v486_v40 }
 0x115   : > { %v535_v48 = vpack.c.bf16 %v492_v46, %v488_v44 }
 0x116   : > { %1444 = vmatprep.subr.bf16.mxu0 %v519_v47 }
 0x117   : > { %v495_v49 = vpop.f32.mrb[24].mxu0  ;;  %1445 = vmatpush3.bf16.xpose.msra.mxu0 %v519_v47  ;;  %1476 = vmatprep.subr.bf16.mxu1 %v535_v48 }
 0x118   : > { %v497_v50 = vpop.f32.mrb[25].mxu0  ;;  %1477 = vmatpush3.bf16.msra.mxu1 %v535_v48  ;;  %v496_v54 = vadd.f32 %v495_v49, %v1815_v60 }
 0x119   : > { %v499_v52 = vpop.f32.mrb[26].mxu0  ;;  %v498_v59 = vadd.f32 %v497_v50, %v1817_v62 }
 0x11a   : > { %v500_v56 = vadd.f32 %v499_v52, %v1815_v60  ;;  %v501_v58 = vpop.f32.mrb[27].mxu0 }
 0x11b   : > { %v502_v63 = vadd.f32 %v501_v58, %v1817_v62 }
 0x11c   : > { %v520_v1 = vpack.c.bf16 %v500_v56, %v496_v54 }
 0x11d   : > { %v536_v2 = vpack.c.bf16 %v502_v63, %v498_v59 }
 0x11e   : > { %1446 = vmatprep.subr.bf16.mxu0 %v520_v1 }
 0x11f   : > { %v505_v3 = vpop.f32.mrb[28].mxu0  ;;  %1447 = vmatpush3.bf16.xpose.msra.mxu0 %v520_v1  ;;  %1478 = vmatprep.subr.bf16.mxu1 %v536_v2 }
 0x120   : > { %v507_v6 = vpop.f32.mrb[29].mxu0  ;;  %1479 = vmatpush3.bf16.msra.mxu1 %v536_v2  ;;  %v506_v8 = vadd.f32 %v505_v3, %v1815_v60 }
 0x121   : > { %v509_v7 = vpop.f32.mrb[30].mxu0  ;;  %v508_v12 = vadd.f32 %v507_v6, %v1817_v62 }
 0x122   : > { %v510_v9 = vadd.f32 %v509_v7, %v1815_v60  ;;  %v511_v11 = vpop.f32.mrb[31].mxu0  ;;  %v724_v60 = vand.u32 127, %v346_v55 }
 0x123   : > { %v512_v13 = vadd.f32 %v511_v11, %v1817_v62 }
 0x124   : > { %v521_v14 = vpack.c.bf16 %v510_v9, %v506_v8  ;;  %vm725_vm1 = vcmp.lt.s32.totalorder %v724_v60, 64 }
 0x125   : > { %v537_v17 = vpack.c.bf16 %v512_v13, %v508_v12 }
 0x126   : > { %1448 = vmatprep.subr.bf16.mxu0 %v521_v14 }
 0x127   : > { %1449 = vmatpush3.bf16.xpose.msra.mxu0 %v521_v14  ;;  %1480 = vmatprep.subr.bf16.mxu1 %v537_v17 }
 0x128   : > { %1481 = vmatpush3.bf16.msra.mxu1 %v537_v17 }
 0x12e   : > { %1451 = vmatmul.mubr.bf16.vlgmr.msra.gmra.mrb[32].mxu0 %v716_v21 }
 0x12f   : > { %1454 = vmatprep.mubr.bf16.mxu0 %v717_v45 }
 0x136   : > { %1455 = vmatmul.mubr.bf16.gmra.mrb[36].mxu0 %v718_v41 }
 0x137   : > { %1458 = vmatprep.mubr.bf16.mxu0 %v719_v5 }
 0x13e   : > { %1459 = vmatmul.mubr.bf16.gmra.mrb[40].mxu0 %v720_v0 }
 0x13f   : > { %1462 = vmatprep.mubr.bf16.mxu0 %v721_v29 }
 0x146   : > { %1463 = vmatmul.mubr.bf16.gmra.mrb[44].mxu0 %v722_v25 }
 0x201   : > { %v1452_v62 = vpop.f32.mrb[32].mxu0 }
 0x202   : > { %v776_v10 = vpop.f32.mrb[33].mxu0  ;;  %v843_v16 = vsel %vm725_vm1, %v1452_v62, -1e+30 }
 0x203   : > { %861 = vmax.xlane.f32.xlu1 %v843_v16  ;;  %v1453_v21 = vpop.f32.mrb[34].mxu0  ;;  %v841_v31 = vsel %vm725_vm1, %v776_v10, -1e+30 }
 0x204   : > { %857 = vmax.xlane.f32.xlu0 %v841_v31  ;;  %v779_v33 = vpop.f32.mrb[35].mxu0  ;;  %v844_v36 = vsel %vm725_vm1, %v1453_v21, -1e+30 }
 0x205   : > { %v842_v39 = vsel %vm725_vm1, %v779_v33, -1e+30 }
 0x207   : > { %863 = vmax.xlane.f32.xlu1 %v844_v36 }
 0x208   : > { %859 = vmax.xlane.f32.xlu0 %v842_v39 }
 0x209   : > { %v1456_v41 = vpop.f32.mrb[36].mxu0 }
 0x20a   : > { %v792_v45 = vpop.f32.mrb[37].mxu0  ;;  %v847_v61 = vsel %vm725_vm1, %v1456_v41, -1e+30 }
 0x20b   : > { %v1457_v55 = vpop.f32.mrb[38].mxu0  ;;  %v845_v51 = vsel %vm725_vm1, %v792_v45, -1e+30 }
 0x20c   : > { %865 = vmax.xlane.f32.xlu0 %v845_v51  ;;  %v795_v53 = vpop.f32.mrb[39].mxu0  ;;  %v848_v5 = vsel %vm725_vm1, %v1457_v55, -1e+30 }
 0x20d   : > { %v846_v57 = vsel %vm725_vm1, %v795_v53, -1e+30 }
 0x20e   : > { %867 = vmax.xlane.f32.xlu1 %v846_v57 }
 0x210   : > { %869 = vmax.xlane.f32.xlu0 %v847_v61 }
 0x211   : > { %v1460_v0 = vpop.f32.mrb[40].mxu0 }
 0x212   : > { %871 = vmax.xlane.f32.xlu1 %v848_v5  ;;  %v808_v18 = vpop.f32.mrb[41].mxu0  ;;  %v1941_v24 = vsel %vm725_vm1, %v1460_v0, -1e+30 }
 0x213   : > { %v1461_v19 = vpop.f32.mrb[42].mxu0  ;;  %v849_v20 = vsel %vm725_vm1, %v808_v18, -1e+30 }
 0x214   : > { %873 = vmax.xlane.f32.xlu0 %v849_v20  ;;  %v811_v22 = vpop.f32.mrb[43].mxu0  ;;  %v1945_v26 = vsel %vm725_vm1, %v1461_v19, -1e+30 }
 0x215   : > { %v1937_v23 = vsel %vm725_vm1, %v811_v22, -1e+30 }
 0x216   : > { %875 = vmax.xlane.f32.xlu1 %v1937_v23 }
 0x218   : > { %877 = vmax.xlane.f32.xlu0 %v1941_v24 }
 0x219   : > { %v1464_v25 = vpop.f32.mrb[44].mxu0 }
 0x21a   : > { %879 = vmax.xlane.f32.xlu1 %v1945_v26  ;;  %v824_v27 = vpop.f32.mrb[45].mxu0  ;;  %v1957_v34 = vsel %vm725_vm1, %v1464_v25, -1e+30 }
 0x21b   : > { %v1465_v28 = vpop.f32.mrb[46].mxu0  ;;  %v1949_v29 = vsel %vm725_vm1, %v824_v27, -1e+30 }
 0x21c   : > { %881 = vmax.xlane.f32.xlu0 %v1949_v29  ;;  %v827_v30 = vpop.f32.mrb[47].mxu0  ;;  %v1961_v35 = vsel %vm725_vm1, %v1465_v28, -1e+30 }
 0x21d   : > { %v1953_v32 = vsel %vm725_vm1, %v827_v30, -1e+30 }
 0x21e   : > { %883 = vmax.xlane.f32.xlu1 %v1953_v32 }
 0x220   : > { %885 = vmax.xlane.f32.xlu0 %v1957_v34 }
 0x222   : > { %887 = vmax.xlane.f32.xlu1 %v1961_v35 }
 0x290   : > { %v1964_v37 = vpop.xlane.xlu1 %861 }
 0x291   : > { %v939_v4 = vsub.f32 %v843_v16, %v1964_v37  ;;  %v1967_v38 = vpop.xlane.xlu0 %857 }
 0x292   : > { %v937_v40 = vsub.f32 %v841_v31, %v1967_v38 }
 0x293   : > { %v957_v42 = vmul.f32 1.442695, %v939_v4 }
 0x294   : > { %v1970_v43 = vpop.xlane.xlu1 %863  ;;  %v953_v44 = vmul.f32 1.442695, %v937_v40 }
 0x295   : > { %v940_v46 = vsub.f32 %v844_v36, %v1970_v43  ;;  %v1973_v47 = vpop.xlane.xlu0 %859  ;;  %1531 = vpow2.f32 %v957_v42 }
 0x296   : > { %v938_v48 = vsub.f32 %v842_v39, %v1973_v47  ;;  %1533 = vpow2.f32 %v953_v44 }
 0x297   : > { %v959_v49 = vmul.f32 1.442695, %v940_v46 }
 0x298   : > { %v955_v50 = vmul.f32 1.442695, %v938_v48 }
 0x299   : > { %v1976_v52 = vpop.xlane.xlu0 %865  ;;  %1535 = vpow2.f32 %v959_v49 }
 0x29a   : > { %v941_v54 = vsub.f32 %v845_v51, %v1976_v52  ;;  %1537 = vpow2.f32 %v955_v50 }
 0x29b   : > { %v1979_v56 = vpop.xlane.xlu1 %867 }
 0x29c   : > { %v942_v58 = vsub.f32 %v846_v57, %v1979_v56  ;;  %v961_v63 = vmul.f32 1.442695, %v941_v54 }
 0x29d   : > { %v1982_v59 = vpop.xlane.xlu0 %869 }
 0x29e   : > { %v943_v1 = vsub.f32 %v847_v61, %v1982_v59  ;;  %v963_v2 = vmul.f32 1.442695, %v942_v58  ;;  %v891_v58 = vsub.f32 -inf, %v1964_v37 }
 0x29f   : > { %v1985_v3 = vpop.xlane.xlu1 %871  ;;  %v1532_v6 = vpop.eup %1531 }
 0x2a0   : > { %v965_v7 = vmul.f32 1.442695, %v943_v1  ;;  %1539 = vpow2.f32 %v963_v2  ;;  %v944_v8 = vsub.f32 %v848_v5, %v1985_v3  ;;  %1005 = vadd.xlane.f32.xlu0 %v1532_v6  ;;  %v1534_v12 = vpop.eup %1533  ;;  %v892_v1 = vsub.f32 -inf, %v1970_v43 }
 0x2a1   : > { %v1988_v9 = vpop.xlane.xlu0 %873  ;;  %1541 = vpow2.f32 %v961_v63  ;;  %v889_v63 = vsub.f32 -inf, %v1967_v38  ;;  %v890_v2 = vsub.f32 -inf, %v1973_v47  ;;  %v896_v37 = vsub.f32 -inf, %v1985_v3 }
 0x2a2   : > { %v945_v11 = vsub.f32 %v849_v20, %v1988_v9  ;;  %1543 = vpow2.f32 %v965_v7  ;;  %v967_v13 = vmul.f32 1.442695, %v944_v8  ;;  %v894_v43 = vsub.f32 -inf, %v1979_v56 }
 0x2a3   : > { %v1991_v14 = vpop.xlane.xlu1 %875  ;;  %v1536_v17 = vpop.eup %1535  ;;  %v905_v7 = vmul.f32 1.442695, %v889_v63 }
 0x2a4   : > { %v969_v60 = vmul.f32 1.442695, %v945_v11  ;;  %1545 = vpow2.f32 %v967_v13  ;;  %v946_v62 = vsub.f32 %v1937_v23, %v1991_v14  ;;  %1001 = vadd.xlane.f32.xlu0 %v1534_v12  ;;  %1007 = vadd.xlane.f32.xlu1 %v1536_v17  ;;  %v1538_v16 = vpop.eup %1537  ;;  %v1050_v41 = vpack.c.bf16 %v1536_v17, %v1532_v6 }
 0x2a5   : > { %v1995_v10 = vpop.xlane.xlu0 %877  ;;  %v1049_v33 = vpack.c.bf16 %v1538_v16, %v1534_v12  ;;  %v909_v6 = vmul.f32 1.442695, %v891_v58  ;;  %v911_v11 = vmul.f32 1.442695, %v892_v1  ;;  %v907_v12 = vmul.f32 1.442695, %v890_v2 }
 0x2a6   : > { %v947_v21 = vsub.f32 %v1941_v24, %v1995_v10  ;;  %v971_v31 = vmul.f32 1.442695, %v946_v62  ;;  %1547 = vpow2.f32 %v969_v60  ;;  %v895_v17 = vsub.f32 -inf, %v1982_v59 }
 0x2a7   : > { %v1999_v36 = vpop.xlane.xlu1 %879  ;;  %1482 = vmatprep.mubr.bf16.mxu1 %v1049_v33  ;;  %v893_v60 = vsub.f32 -inf, %v1976_v52  ;;  %v899_v59 = vsub.f32 -inf, %v1995_v10 }
 0x2a8   : > { %v973_v39 = vmul.f32 1.442695, %v947_v21  ;;  %1549 = vpow2.f32 %v971_v31  ;;  %v948_v45 = vsub.f32 %v1945_v26, %v1999_v36  ;;  %1003 = vadd.xlane.f32.xlu1 %v1538_v16  ;;  %1483 = vmatmul.mubr.bf16.vlgmr.msra.gmra.mrb[16].mxu1 %v1050_v41  ;;  %v917_v47 = vmul.f32 1.442695, %v895_v17 }
 0x2a9   : > { %v2003_v55 = vpop.xlane.xlu0 %881  ;;  %v913_v16 = vmul.f32 1.442695, %v893_v60  ;;  %v919_v21 = vmul.f32 1.442695, %v896_v37  ;;  %v897_v31 = vsub.f32 -inf, %v1988_v9  ;;  %v898_v41 = vsub.f32 -inf, %v1991_v14 }
 0x2aa   : > { %v949_v51 = vsub.f32 %v1949_v29, %v2003_v55  ;;  %v1540_v53 = vpop.eup %1539  ;;  %1551 = vpow2.f32 %v973_v39  ;;  %v975_v57 = vmul.f32 1.442695, %v948_v45  ;;  %v915_v39 = vmul.f32 1.442695, %v894_v43 }
 0x2ab   : > { %v2007_v61 = vpop.xlane.xlu1 %883  ;;  %v1542_v0 = vpop.eup %1541  ;;  %v900_v3 = vsub.f32 -inf, %v1999_v36  ;;  %v921_v56 = vmul.f32 1.442695, %v897_v31  ;;  %v925_v9 = vmul.f32 1.442695, %v899_v59 }
 0x2ac   : > { %v977_v5 = vmul.f32 1.442695, %v949_v51  ;;  %v1544_v18 = vpop.eup %1543  ;;  %1553 = vpow2.f32 %v975_v57  ;;  %v950_v19 = vsub.f32 %v1953_v32, %v2007_v61  ;;  %v1051_v20 = vpack.c.bf16 %v1540_v53, %v1542_v0 }
 0x2ad   : > { %v2011_v22 = vpop.xlane.xlu0 %885  ;;  %1013 = vadd.xlane.f32.xlu0 %v1544_v18  ;;  %v923_v57 = vmul.f32 1.442695, %v898_v41 }
 0x2ae   : > { %v951_v23 = vsub.f32 %v1957_v34, %v2011_v22  ;;  %v1546_v24 = vpop.eup %1545  ;;  %v979_v25 = vmul.f32 1.442695, %v950_v19  ;;  %1486 = vmatprep.mubr.bf16.mxu1 %v1051_v20  ;;  %1555 = vpow2.f32 %v977_v5  ;;  %v927_v19 = vmul.f32 1.442695, %v900_v3 }
 0x2af   : > { %v2015_v26 = vpop.xlane.xlu1 %887  ;;  %1015 = vadd.xlane.f32.xlu1 %v1546_v24  ;;  %v1052_v29 = vpack.c.bf16 %v1546_v24, %v1544_v18  ;;  %v901_v24 = vsub.f32 -inf, %v2003_v55 }
 0x2b0   : > { %v981_v27 = vmul.f32 1.442695, %v951_v23  ;;  %1557 = vpow2.f32 %v979_v25  ;;  %v952_v28 = vsub.f32 %v1961_v35, %v2015_v26  ;;  %v1548_v30 = vpop.eup %1547 }
 0x2b1   : > { %1009 = vadd.xlane.f32.xlu0 %v1542_v0  ;;  %1487 = vmatmul.mubr.bf16.gmra.mrb[20].mxu1 %v1052_v29  ;;  %v902_v29 = vsub.f32 -inf, %v2007_v61 }
 0x2b2   : > { %v1550_v32 = vpop.eup %1549  ;;  %v983_v4 = vmul.f32 1.442695, %v952_v28  ;;  %1559 = vpow2.f32 %v981_v27  ;;  %v903_v27 = vsub.f32 -inf, %v2011_v22 }
 0x2b3   : > { %1011 = vadd.xlane.f32.xlu1 %v1540_v53  ;;  %v1053_v34 = vpack.c.bf16 %v1550_v32, %v1548_v30 }
 0x2b4   : > { %v1552_v40 = vpop.eup %1551  ;;  %1561 = vpow2.f32 %v983_v4  ;;  %v904_v4 = vsub.f32 -inf, %v2015_v26  ;;  %v933_v55 = vmul.f32 1.442695, %v903_v27 }
 0x2b5   : > { %1490 = vmatprep.mubr.bf16.mxu1 %v1053_v34  ;;  %1021 = vadd.xlane.f32.xlu0 %v1552_v40  ;;  %1563 = vpow2.f32 %v909_v6 }
 0x2b6   : > { %v1554_v42 = vpop.eup %1553  ;;  %1565 = vpow2.f32 %v905_v7 }
 0x2b7   : > { %1023 = vadd.xlane.f32.xlu1 %v1554_v42  ;;  %v1054_v44 = vpack.c.bf16 %v1554_v42, %v1552_v40  ;;  %1567 = vpow2.f32 %v911_v11  ;;  %v929_v42 = vmul.f32 1.442695, %v901_v24 }
 0x2b8   : > { %v1556_v46 = vpop.eup %1555  ;;  %1569 = vpow2.f32 %v907_v12 }
 0x2b9   : > { %1017 = vadd.xlane.f32.xlu0 %v1548_v30  ;;  %1491 = vmatmul.mubr.bf16.gmra.mrb[24].mxu1 %v1054_v44  ;;  %1571 = vpow2.f32 %v917_v47 }
 0x2ba   : > { %v1558_v48 = vpop.eup %1557  ;;  %1573 = vpow2.f32 %v913_v16 }
 0x2bb   : > { %1019 = vadd.xlane.f32.xlu1 %v1550_v32  ;;  %v1055_v35 = vpack.c.bf16 %v1558_v48, %v1556_v46  ;;  %1575 = vpow2.f32 %v919_v21 }
 0x2bc   : > { %v1560_v49 = vpop.eup %1559  ;;  %1577 = vpow2.f32 %v915_v39 }
 0x2bd   : > { %1025 = vadd.xlane.f32.xlu0 %v1556_v46  ;;  %1494 = vmatprep.mubr.bf16.mxu1 %v1055_v35  ;;  %1579 = vpow2.f32 %v921_v56  ;;  %v931_v35 = vmul.f32 1.442695, %v902_v29 }
 0x2be   : > { %v1562_v50 = vpop.eup %1561  ;;  %1581 = vpow2.f32 %v923_v57 }
 0x2bf   : > { %1027 = vadd.xlane.f32.xlu1 %v1558_v48  ;;  %v1056_v54 = vpack.c.bf16 %v1562_v50, %v1560_v49  ;;  %v1564_v45 = vpop.eup %1563  ;;  %1583 = vpow2.f32 %v925_v9 }
 0x2c0   : > { %v1566_v51 = vpop.eup %1565  ;;  %v987_v5 = vmul.f32 0.0, %v1564_v45  ;;  %1585 = vpow2.f32 %v927_v19 }
 0x2c1   : > { %1029 = vadd.xlane.f32.xlu0 %v1560_v49  ;;  %1495 = vmatmul.mubr.bf16.gmra.mrb[28].mxu1 %v1056_v54  ;;  %v1568_v53 = vpop.eup %1567  ;;  %v985_v14 = vmul.f32 0.0, %v1566_v51  ;;  %v935_v49 = vmul.f32 1.442695, %v904_v4 }
 0x2c2   : > { %v1570_v0 = vpop.eup %1569  ;;  %v988_v10 = vmul.f32 0.0, %v1568_v53 }
 0x2c3   : > { %1031 = vadd.xlane.f32.xlu1 %v1562_v50  ;;  %v986_v25 = vmul.f32 0.0, %v1570_v0  ;;  %v1572_v32 = vpop.eup %1571 }
 0x2c4   : > { %v1574_v40 = vpop.eup %1573  ;;  %v2035_v22 = vmul.f32 0.0, %v1572_v32 }
 0x2c5   : > { %v1576_v44 = vpop.eup %1575  ;;  %v2037_v61 = vmul.f32 0.0, %v1574_v40 }
 0x2c6   : > { %v1578_v48 = vpop.eup %1577  ;;  %v2040_v50 = vmul.f32 0.0, %v1576_v44 }
 0x2c7   : > { %v1580_v54 = vpop.eup %1579  ;;  %v2043_v63 = vmul.f32 0.0, %v1578_v48 }
 0x2c8   : > { %v1582_v2 = vpop.eup %1581  ;;  %v2049_v39 = vmul.f32 0.0, %v1580_v54 }
 0x2c9   : > { %v1584_v7 = vpop.eup %1583  ;;  %v2062_v0 = vmul.f32 0.0, %v1582_v2 }
 0x32d   : > { %v1006_v8 = vpop.xlane.xlu0 %1005 }
 0x32e   : > { %v1035_v20 = vadd.f32 %v1006_v8, %v987_v5 }
 0x330   : > { %1587 = vrcp.f32 %v1035_v20 }
 0x331   : > { %v1008_v13 = vpop.xlane.xlu1 %1007  ;;  %v1002_v38 = vpop.xlane.xlu0 %1001 }
 0x332   : > { %v1033_v36 = vadd.f32 %v1002_v38, %v985_v14  ;;  %v1036_v28 = vadd.f32 %v1008_v13, %v988_v10  ;;  %v1586_v13 = vpop.eup %1585 }
 0x333   : > { %v2058_v51 = vmul.f32 0.0, %v1586_v13  ;;  %v1631_v13 = vld [vmem:[%s1753_s19 + $0x20] sm:$0xff] }
 0x334   : > { %1589 = vrcp.f32 %v1033_v36  ;;  %v1629_v36 = vld [vmem:[%s1753_s19 + $0x8] sm:$0xff] }
 0x335   : > { %v1004_v62 = vpop.xlane.xlu1 %1003  ;;  %1591 = vrcp.f32 %v1036_v28 }
 0x336   : > { %v1034_v30 = vadd.f32 %v1004_v62, %v986_v25  ;;  %v2047_v62 = vmul.f32 0.0, %v1584_v7 }
 0x338   : > { %1593 = vrcp.f32 %v1034_v30 }
 0x339   : > { %1595 = vpow2.f32 %v929_v42 }
 0x33a   : > { %v1014_v33 = vpop.xlane.xlu0 %1013  ;;  %1597 = vpow2.f32 %v933_v55  ;;  %v1588_v37 = vpop.eup %1587 }
 0x33b   : > { %v1039_v26 = vadd.f32 %v1014_v33, %v2035_v22  ;;  %1599 = vpow2.f32 %v931_v35 }
 0x33c   : > { %v1016_v52 = vpop.xlane.xlu1 %1015  ;;  %1601 = vpow2.f32 %v935_v49 }
 0x33d   : > { %v1040_v6 = vadd.f32 %v1016_v52, %v2040_v50  ;;  %1603 = vrcp.f32 %v1039_v26 }
 0x33e   : > { %v1010_v18 = vpop.xlane.xlu0 %1009  ;;  %v1590_v47 = vpop.eup %1589 }
 0x33f   : > { %v1037_v58 = vadd.f32 %v1010_v18, %v2037_v61  ;;  %v1592_v33 = vpop.eup %1591 }
 0x340   : > { %v1012_v23 = vpop.xlane.xlu1 %1011 }
 0x341   : > { %v1038_v8 = vadd.f32 %v1012_v23, %v2043_v63  ;;  %1605 = vrcp.f32 %v1037_v58 }
 0x342   : > { %v1022_v34 = vpop.xlane.xlu0 %1021  ;;  %1607 = vrcp.f32 %v1040_v6  ;;  %v1594_v45 = vpop.eup %1593 }
 0x343   : > { %1609 = vrcp.f32 %v1038_v8  ;;  %v1043_v3 = vadd.f32 %v1022_v34, %v2047_v62  ;;  %v1630_v8 = vld [vmem:[%s1753_s19 + $0x30] sm:$0xff] }
 0x344   : > { %v1024_v46 = vpop.xlane.xlu1 %1023 }
 0x345   : > { %v1044_v20 = vadd.f32 %v1024_v46, %v2058_v51  ;;  %1611 = vrcp.f32 %v1043_v3 }
 0x346   : > { %v1018_v1 = vpop.xlane.xlu0 %1017 }
 0x347   : > { %v1041_v57 = vadd.f32 %v1018_v1, %v2049_v39 }
 0x348   : > { %v1020_v11 = vpop.xlane.xlu1 %1019 }
 0x349   : > { %v1042_v24 = vadd.f32 %v1020_v11, %v2062_v0  ;;  %1613 = vrcp.f32 %v1041_v57 }
 0x34a   : > { %v1026_v41 = vpop.xlane.xlu0 %1025  ;;  %1615 = vrcp.f32 %v1044_v20 }
 0x34b   : > { %1617 = vrcp.f32 %v1042_v24 }
 0x34c   : > { %v1028_v9 = vpop.xlane.xlu1 %1027 }
 0x34e   : > { %v1030_v30 = vpop.xlane.xlu0 %1029 }
 0x350   : > { %v1032_v48 = vpop.xlane.xlu1 %1031 }
 0x37b   : > { %v1484_v12 = vpop.f32.mrb[16].mxu1 }
 0x37c   : > { %v1156_v17 = vadd.f32 %v1484_v12, %v987_v5  ;;  %v1091_v60 = vpop.f32.mrb[17].mxu1  ;;  %v1627_v5 = vld [vmem:[%s1753_s19] sm:$0xff] }
 0x37d   : > { %v1154_v38 = vadd.f32 %v1091_v60, %v985_v14  ;;  %v1485_v43 = vpop.f32.mrb[18].mxu1  ;;  %v1596_v14 = vpop.eup %1595 }
 0x37e   : > { %v1188_v16 = vmul.f32 %v1588_v37, %v1156_v17  ;;  %v1157_v21 = vadd.f32 %v1485_v43, %v988_v10  ;;  %v1094_v31 = vpop.f32.mrb[19].mxu1  ;;  %v1628_v10 = vld [vmem:[%s1753_s19 + $0x18] sm:$0xff]  ;;  %v2081_v46 = vmul.f32 0.0, %v1596_v14  ;;  %v1633_v43 = vld [vmem:[%s1753_s19 + $0x28] sm:$0xff] }
 0x37f   : > { %v1186_v59 = vmul.f32 %v1590_v47, %v1154_v38  ;;  %v1155_v52 = vadd.f32 %v1094_v31, %v986_v25  ;;  %v1632_v38 = vld [vmem:[%s1753_s19 + $0x38] sm:$0xff] }
 0x380   : > { %v1204_v56 = vadd.f32 %v1188_v16, %v1762_v15  ;;  %v1189_v53 = vmul.f32 %v1592_v33, %v1157_v21  ;;  %v1598_v15 = vpop.eup %1597  ;;  %v1045_v6 = vadd.f32 %v1026_v41, %v2081_v46 }
 0x381   : > { %v1202_v18 = vadd.f32 %v1627_v5, %v1186_v59  ;;  %v1187_v19 = vmul.f32 %v1594_v45, %v1155_v52  ;;  %v1600_v27 = vpop.eup %1599  ;;  %v2078_v40 = vmul.f32 0.0, %v1598_v15  ;;  %v1634_v5 = vld [vmem:[%s1753_s19 + $0x50] sm:$0xff] }
 0x382   : > { %1220 = vst.msk [vmem:[%s2055_s29 + $0x10] sm:$0xff] %vm376_vm0, %v1204_v56  ;;  %v1205_v23 = vadd.f32 %v1628_v10, %v1189_v53  ;;  %v1602_v29 = vpop.eup %1601  ;;  %v998_v7 = vmul.f32 0.0, %v1600_v27  ;;  %v1636_v10 = vld [vmem:[%s1753_s19 + $0x58] sm:$0xff] }
 0x383   : > { %1218 = vst.msk [vmem:[%s2055_s29] sm:$0xff] %vm376_vm0, %v1202_v18  ;;  %v1203_v25 = vadd.f32 %v1629_v36, %v1187_v19  ;;  %v1604_v34 = vpop.eup %1603  ;;  %v1047_v54 = vadd.f32 %v1030_v30, %v2078_v40  ;;  %v1000_v58 = vmul.f32 0.0, %v1602_v29  ;;  %v1635_v19 = vld [vmem:[%s1753_s19 + $0x40] sm:$0xff] }
 0x384   : > { %1221 = vst.msk [vmem:[%s2055_s29 + $0x18] sm:$0xff] %vm376_vm0, %v1205_v23  ;;  %v1488_v28 = vpop.f32.mrb[20].mxu1  ;;  %v1606_v55 = vpop.eup %1605  ;;  %v1046_v37 = vadd.f32 %v1028_v9, %v998_v7 }
 0x385   : > { %1219 = vst.msk [vmem:[%s2055_s29 + $0x8] sm:$0xff] %vm376_vm0, %v1203_v25  ;;  %v1160_v32 = vadd.f32 %v1488_v28, %v2035_v22  ;;  %v1107_v4 = vpop.f32.mrb[21].mxu1  ;;  %v1608_v22 = vpop.eup %1607  ;;  %v1048_v12 = vadd.f32 %v1032_v48, %v1000_v58  ;;  %1619 = vrcp.f32 %v1047_v54 }
 0x386   : > { %v1158_v42 = vadd.f32 %v1107_v4, %v2037_v61  ;;  %v1489_v44 = vpop.f32.mrb[22].mxu1  ;;  %v1610_v2 = vpop.eup %1609  ;;  %1621 = vrcp.f32 %v1045_v6 }
 0x387   : > { %v1192_v35 = vmul.f32 %v1604_v34, %v1160_v32  ;;  %v1161_v49 = vadd.f32 %v1489_v44, %v2040_v50  ;;  %v1110_v26 = vpop.f32.mrb[23].mxu1  ;;  %v1612_v33 = vpop.eup %1611  ;;  %1623 = vrcp.f32 %v1048_v12 }
 0x388   : > { %v1190_v1 = vmul.f32 %v1606_v55, %v1158_v42  ;;  %v1159_v61 = vadd.f32 %v1110_v26, %v2043_v63  ;;  %v1614_v52 = vpop.eup %1613  ;;  %1625 = vrcp.f32 %v1046_v37  ;;  %v1638_v55 = vld [vmem:[%s1753_s19 + $0x70] sm:$0xff] }
 0x389   : > { %v1208_v11 = vadd.f32 %v1630_v8, %v1192_v35  ;;  %v1193_v50 = vmul.f32 %v1608_v22, %v1161_v49  ;;  %v1616_v56 = vpop.eup %1615  ;;  %v1639_v49 = vld [vmem:[%s1753_s19 + $0x60] sm:$0xff]  ;;  %v1640_v22 = vld [vmem:[%s1753_s19 + $0x78] sm:$0xff] }
 0x38a   : > { %v1206_v17 = vadd.f32 %v1631_v13, %v1190_v1  ;;  %v1191_v60 = vmul.f32 %v1610_v2, %v1159_v61  ;;  %v1618_v9 = vpop.eup %1617 }
 0x38b   : > { %1224 = vst.msk [vmem:[%s2055_s29 + $0x30] sm:$0xff] %vm376_vm0, %v1208_v11  ;;  %v1209_v63 = vadd.f32 %v1632_v38, %v1193_v50 }
 0x38c   : > { %1222 = vst.msk [vmem:[%s2055_s29 + $0x20] sm:$0xff] %vm376_vm0, %v1206_v17  ;;  %v1207_v47 = vadd.f32 %v1633_v43, %v1191_v60  ;;  %v1492_v16 = vpop.f32.mrb[24].mxu1 }
 0x38d   : > { %1225 = vst.msk [vmem:[%s2055_s29 + $0x38] sm:$0xff] %vm376_vm0, %v1209_v63  ;;  %v1164_v21 = vadd.f32 %v1492_v16, %v2047_v62  ;;  %v1123_v31 = vpop.f32.mrb[25].mxu1 }
 0x38e   : > { %1223 = vst.msk [vmem:[%s2055_s29 + $0x28] sm:$0xff] %vm376_vm0, %v1207_v47  ;;  %v1162_v41 = vadd.f32 %v1123_v31, %v2049_v39  ;;  %v1493_v59 = vpop.f32.mrb[26].mxu1 }
 0x38f   : > { %v1196_v45 = vmul.f32 %v1612_v33, %v1164_v21  ;;  %v1165_v3 = vadd.f32 %v1493_v59, %v2058_v51  ;;  %v1126_v62 = vpop.f32.mrb[27].mxu1  ;;  %v1637_v51 = vld [vmem:[%s1753_s19 + $0x48] sm:$0xff]  ;;  %v1620_v25 = vpop.eup %1619 }
 0x390   : > { %v1194_v53 = vmul.f32 %v1614_v52, %v1162_v41  ;;  %v1163_v57 = vadd.f32 %v1126_v62, %v2062_v0  ;;  %v1622_v29 = vpop.eup %1621 }
 0x391   : > { %v1212_v18 = vadd.f32 %v1634_v5, %v1196_v45  ;;  %v1197_v39 = vmul.f32 %v1616_v56, %v1165_v3  ;;  %v1624_v34 = vpop.eup %1623 }
 0x392   : > { %v1210_v14 = vadd.f32 %v1635_v19, %v1194_v53  ;;  %v1195_v20 = vmul.f32 %v1618_v9, %v1163_v57  ;;  %v1626_v44 = vpop.eup %1625 }
 0x393   : > { %1228 = vst.msk [vmem:[%s2055_s29 + $0x50] sm:$0xff] %vm376_vm0, %v1212_v18  ;;  %v1213_v23 = vadd.f32 %v1636_v10, %v1197_v39 }
 0x394   : > { %1226 = vst.msk [vmem:[%s2055_s29 + $0x40] sm:$0xff] %vm376_vm0, %v1210_v14  ;;  %v1211_v15 = vadd.f32 %v1637_v51, %v1195_v20  ;;  %v1496_v24 = vpop.f32.mrb[28].mxu1 }
 0x395   : > { %1229 = vst.msk [vmem:[%s2055_s29 + $0x58] sm:$0xff] %vm376_vm0, %v1213_v23  ;;  %v1168_v0 = vadd.f32 %v1496_v24, %v2078_v40  ;;  %v1139_v36 = vpop.f32.mrb[29].mxu1 }
 0x396   : > { %1227 = vst.msk [vmem:[%s2055_s29 + $0x48] sm:$0xff] %vm376_vm0, %v1211_v15  ;;  %v1166_v27 = vadd.f32 %v1139_v36, %v2081_v46  ;;  %v1497_v28 = vpop.f32.mrb[30].mxu1 }
 0x397   : > { %v1200_v30 = vmul.f32 %v1620_v25, %v1168_v0  ;;  %v1169_v32 = vadd.f32 %v1497_v28, %v1000_v58  ;;  %v1142_v4 = vpop.f32.mrb[31].mxu1  ;;  %v1641_v58 = vld [vmem:[%s1753_s19 + $0x68] sm:$0xff] }
 0x398   : > { %v1198_v42 = vmul.f32 %v1622_v29, %v1166_v27  ;;  %v1167_v40 = vadd.f32 %v1142_v4, %v998_v7 }
 0x399   : > { %v1216_v48 = vadd.f32 %v1638_v55, %v1200_v30  ;;  %v1201_v35 = vmul.f32 %v1624_v34, %v1169_v32 }
 0x39a   : > { %v1214_v46 = vadd.f32 %v1639_v49, %v1198_v42  ;;  %v1199_v26 = vmul.f32 %v1626_v44, %v1167_v40 }
 0x39b   : > { %1232 = vst.msk [vmem:[%s2055_s29 + $0x70] sm:$0xff] %vm376_vm0, %v1216_v48  ;;  %v1217_v54 = vadd.f32 %v1640_v22, %v1201_v35 }
 0x39c   : > { %1230 = vst.msk [vmem:[%s2055_s29 + $0x60] sm:$0xff] %vm376_vm0, %v1214_v46  ;;  %v1215_v1 = vadd.f32 %v1641_v58, %v1199_v26 }
 0x39d   : > { %1233 = vst.msk [vmem:[%s2055_s29 + $0x78] sm:$0xff] %vm376_vm0, %v1217_v54 }
 0x39e   : > { %1231 = vst.msk [vmem:[%s2055_s29 + $0x68] sm:$0xff] %vm376_vm0, %v1215_v1 }
 0x39f PF: > { %s16_s23 = sadd.s32 1, %s1664_s23   ;;  %s2145_s21 = smov %s1660_s22 }
 0x3a0   : > { %p13_p5 = scmp.ge.s32.totalorder %s16_s23, 4   ;;  %s2146_s22 = smov %s2148_s24 }
 0x3a2   :  { %15 = sbr.rel (!%p13_p5) target bundleno = 2 (0x2), region = 81 }

</bundles_post_ra>
